<compile_context>
chip_gen: v5e
topology: v5e:2x2
jax: 0.10.0
libtpu: 0.0.40
codegen_flags: <defaults>
</compile_context>

<pallas_src>
import functools
import math

import jax
import jax.numpy as jnp
from jax import lax
from jax.experimental import pallas as pl
from jax.experimental.pallas import tpu as pltpu


_CB_CAP = 8192  # lane-width cap per block (power of two, multiple of 128)


def _round_up(a, b):
    return -(-a // b) * b


def _choose_2d(total):
    """Lane-dense (rows, cols) factorization with cols a power-of-two * 128."""
    for w in (32768, 16384, 8192, 4096, 2048, 1024, 512, 256, 128):
        if total % w == 0 and total // w >= 8:
            return total // w, w
    return None


def _tree_sum(vals):
    """Pairwise tree-combine of a list of equal-shape arrays."""
    vals = [v for v in vals if v is not None]
    while len(vals) > 1:
        nxt = [vals[a] + vals[a + 1] for a in range(0, len(vals) - 1, 2)]
        if len(vals) % 2:
            nxt.append(vals[-1])
        vals = nxt
    return vals[0]


def _content_loss_kernel(x_ref, t_ref, part_ref, *, rows, block_rows,
                         block_cols, mask_rows):
    i = pl.program_id(0)  # row band
    br, cb = block_rows, block_cols
    n_strips = cb // 128

    # Independent lane-fold accumulators: each (br,128) add is already br//8
    # independent vreg ops, so only short rows (small br) need extra chains.
    nacc = max(1, min(n_strips, 8, (16 * 8) // br))

    # Fused diff/square/fold: one 128-lane strip at a time, no full-tile temps.
    accs = [None] * nacc
    for s in range(n_strips):
        c0 = s * 128
        xs = x_ref[:, c0:c0 + 128].astype(jnp.float32)
        ts = t_ref[:, c0:c0 + 128].astype(jnp.float32)
        d = xs - ts
        sq = d * d
        k = s % nacc
        accs[k] = sq if accs[k] is None else accs[k] + sq
    col = _tree_sum(accs)  # (br, 128)

    # Ragged last row band: one select per tile (garbage stays confined to the
    # garbage rows during the lane fold, so masking after it is sufficient).
    if mask_rows:
        rid = lax.broadcasted_iota(jnp.int32, (br, 1), 0)
        col = jnp.where(rid < (rows - i * br), col, jnp.float32(0.0))

    # Fold rows (br,128) -> (8,128) with a few independent accumulators.
    n_rblk = br // 8
    nracc = max(1, min(n_rblk, 4))
    raccs = [None] * nracc
    for r in range(n_rblk):
        blk = col[r * 8:(r + 1) * 8, :]
        k = r % nracc
        raccs[k] = blk if raccs[k] is None else raccs[k] + blk

    part_ref[...] = _tree_sum(raccs)


def content_loss_forward(x, target, *, max_tile_elems=1024 * 1024,
                         min_pallas_elems=256 * 1024, force_pallas=False):
    """Returns (input_passthrough, loss) like ContentLoss.forward + .loss."""
    assert x.shape == target.shape, "input and target must have the same shape"
    total = math.prod(x.shape)

    # Fast path: tiny activations are cheaper as one fused XLA reduction.
    if total < min_pallas_elems and not force_pallas:
        diff = x.astype(jnp.float32) - target.astype(jnp.float32)
        return x, jnp.mean(diff * diff)

    # Flatten to 2-D with a lane-dense last dim.  If the flat size doesn't
    # factor nicely, zero-pad both operands (pads contribute 0 to the sum of
    # squared differences; we divide by the true element count below).
    xf = x.reshape(-1)
    tf = target.reshape(-1)
    shape2d = _choose_2d(total)
    if shape2d is None:
        padded = _round_up(total, 8 * 128)
        xf = jnp.pad(xf, (0, padded - total))
        tf = jnp.pad(tf, (0, padded - total))
        shape2d = _choose_2d(padded)
    R, C = shape2d
    x2 = xf.reshape(R, C)
    t2 = tf.reshape(R, C)

    itemsize = jnp.dtype(x.dtype).itemsize
    sub = {4: 8, 2: 16, 1: 32}.get(itemsize, 8)   # sublane multiple per dtype

    # Tile selection: power-of-two lane width (divides C exactly -> no column
    # masking), rows sized for ~max_tile_elems elements per input block.
    cb = min(C, _CB_CAP)
    assert C % cb == 0
    br = max(sub, ((max_tile_elems // cb) // sub) * sub)
    if R >= sub:
        br = min(br, (R // sub) * sub)   # keep the block inside the array rows
    br = max(br, sub)

    n_col = C // cb
    n_row = pl.cdiv(R, br)
    # v7x megacore: make sure there are >= 2 grid blocks to shard when possible.
    if n_row * n_col == 1 and R >= 2 * sub:
        br = _round_up(pl.cdiv(R, 2), sub)
        n_row = pl.cdiv(R, br)

    kernel = functools.partial(
        _content_loss_kernel,
        rows=R, block_rows=br, block_cols=cb,
        mask_rows=(R % br) != 0)

    partials = pl.pallas_call(
        kernel,
        out_shape=jax.ShapeDtypeStruct((n_row * 8, n_col * 128), jnp.float32),
        grid_spec=pltpu.PrefetchScalarGridSpec(
            num_scalar_prefetch=0,
            grid=(n_row, n_col),
            in_specs=[
                pl.BlockSpec((br, cb), lambda i, j: (i, j)),
                pl.BlockSpec((br, cb), lambda i, j: (i, j)),
            ],
            out_specs=pl.BlockSpec((8, 128), lambda i, j: (i, j)),
        ),
        compiler_params=pltpu.CompilerParams(
            dimension_semantics=("parallel", "parallel"),
            vmem_limit_bytes=48 * 1024 * 1024,
        ),
    )(x2, t2)

    loss = jnp.sum(partials) / jnp.float32(total)

    # Identity passthrough: return the input itself (no HBM copy), matching
    # `return input` in the PyTorch module.
    return x, loss


if __name__ == "__main__":
    root = jax.random.PRNGKey(0)

    def run_case(key, shape):
        kx, kt = jax.random.split(key)
        x = jax.random.normal(kx, shape, dtype=jnp.float32)
        t = jax.random.normal(kt, shape, dtype=jnp.float32)
        y, loss = content_loss_forward(x, t, force_pallas=True)
        jax.block_until_ready((y, loss))
        ref = jnp.mean((x - t) ** 2)
        assert jnp.allclose(loss, ref, rtol=1e-5, atol=1e-6), (shape, loss, ref)
        assert jnp.array_equal(y, x)

    keys = jax.random.split(root, 3)
    run_case(keys[0], (2, 4, 16, 16))   # clean factorization, single block
    run_case(keys[1], (2, 3, 56, 56))   # ragged rows -> in-kernel row mask
    run_case(keys[2], (2, 3, 17, 19))   # flat size not /128 -> padded path

    # Auto path for tiny inputs (fused XLA fast path), same semantics.
    kx, kt = jax.random.split(jax.random.fold_in(root, 7))
    x = jax.random.normal(kx, (2, 4, 16, 16), dtype=jnp.float32)
    t = jax.random.normal(kt, (2, 4, 16, 16), dtype=jnp.float32)
    y, loss = content_loss_forward(x, t)
    jax.block_until_ready((y, loss))
    assert jnp.allclose(loss, jnp.mean((x - t) ** 2), rtol=1e-5, atol=1e-6)
    assert jnp.array_equal(y, x)

    print("KERNEL_OK")
</pallas_src>

<mosaic_0001>
module attributes {stable_mosaic.version = 11 : i64} {
  func.func @_content_loss_kernel(%arg0: i32, %arg1: i32, %arg2: memref<8x256xf32, #tpu.memory_space<vmem>>, %arg3: memref<8x256xf32, #tpu.memory_space<vmem>>, %arg4: memref<8x128xf32, #tpu.memory_space<vmem>>) attributes {dimension_semantics = [#tpu.dimension_semantics<parallel>, #tpu.dimension_semantics<parallel>], iteration_bounds = array<i64: 1, 1>, scalar_prefetch = 0 : i64, scratch_operands = 0 : i64, tpu.core_type = #tpu.core_type<tc>, window_params = [{transform_indices = @transform_0, window_bounds = array<i64: 8, 256>}, {transform_indices = @transform_1, window_bounds = array<i64: 8, 256>}, {transform_indices = @transform_2, window_bounds = array<i64: 8, 128>}]} {
    %c0 = arith.constant 0 : index
    %c0_0 = arith.constant 0 : index
    %0 = vector.load %arg2[%c0, %c0_0] : memref<8x256xf32, #tpu.memory_space<vmem>>, vector<8x128xf32>
    %c0_1 = arith.constant 0 : index
    %c0_2 = arith.constant 0 : index
    %1 = vector.load %arg3[%c0_1, %c0_2] : memref<8x256xf32, #tpu.memory_space<vmem>>, vector<8x128xf32>
    %2 = arith.subf %0, %1 : vector<8x128xf32>
    %3 = arith.mulf %2, %2 : vector<8x128xf32>
    %c0_3 = arith.constant 0 : index
    %c128 = arith.constant 128 : index
    %4 = vector.load %arg2[%c0_3, %c128] : memref<8x256xf32, #tpu.memory_space<vmem>>, vector<8x128xf32>
    %c0_4 = arith.constant 0 : index
    %c128_5 = arith.constant 128 : index
    %5 = vector.load %arg3[%c0_4, %c128_5] : memref<8x256xf32, #tpu.memory_space<vmem>>, vector<8x128xf32>
    %6 = arith.subf %4, %5 : vector<8x128xf32>
    %7 = arith.mulf %6, %6 : vector<8x128xf32>
    %8 = arith.addf %3, %7 : vector<8x128xf32>
    %c0_6 = arith.constant 0 : index
    %c0_7 = arith.constant 0 : index
    %9 = vector.load %arg4[%c0_6, %c0_7] : memref<8x128xf32, #tpu.memory_space<vmem>>, vector<8x128xf32>
    tpu.vector_store %arg4[%c0_6, %c0_7], %8 {strides = array<i32>} : memref<8x128xf32, #tpu.memory_space<vmem>>, vector<8x128xf32>,
    return
  }
  func.func @transform_0(%arg0: i32, %arg1: i32) -> (i32, i32) {
    %c0_i32 = arith.constant 0 : i32
    return %arg0, %arg1 : i32, i32
  }
  func.func @transform_1(%arg0: i32, %arg1: i32) -> (i32, i32) {
    %c0_i32 = arith.constant 0 : i32
    return %arg0, %arg1 : i32, i32
  }
  func.func @transform_2(%arg0: i32, %arg1: i32) -> (i32, i32) {
    %c0_i32 = arith.constant 0 : i32
    return %arg0, %arg1 : i32, i32
  }
}

</mosaic_0001>

<bundles_post_ra>
// kernel: tpu_custom_call.1
= control target key start
LH: loop header
LB: loop body
LE: loop exit
PB: predicated region body
PF: predicated region fallthrough
CT: control target
= control target key end

     0   :  { %7 = vsyncpa [#allocation3], 0  ;;  %s176_s0 = inlined_call_operand.hbm [shape: f32[8,256], index: 0, kind: input, shape index: {}]   ;;  %s177_s1 = inlined_call_operand.hbm [shape: f32[8,256], index: 1, kind: input, shape index: {}]   ;;  %s178_s2 = inlined_call_operand.hbm [shape: f32[8,128], index: 2, kind: output, shape index: {}]  }
   0x1   :  { %8 = vsyncpa [#allocation6], 0 }
   0x2   :  { %9 = vsyncpa [#allocation4], 0  ;;  %s15_s11 = sshll.u32 %s176_s0, 4  ;;  %s149_s12 = smov [#allocation2]   ;;  %s16_s11 = int_to_ptr.hbm [resolvable:$true] %s15_s11 }
   0x3   :  { %s17_s13 = sshll.u32 %s149_s12, 4  ;;  %s26_s16 = sshll.u32 %s177_s1, 4  ;;  %s18_s13 = int_to_ptr.vmem [resolvable:$true] %s17_s13  ;;  %s27_s16 = int_to_ptr.hbm [resolvable:$true] %s26_s16 }
   0x4   :  { %20 = dma.hbm_to_vmem [thread:$0]  %s16_s11, 256, %s18_s13, [#allocation3]  }
   0x5   :  { %s150_s17 = smov [#allocation5]  }
   0x6   :  { %s28_s18 = sshll.u32 %s150_s17, 4  ;;  %s29_s18 = int_to_ptr.vmem [resolvable:$true] %s28_s18 }
   0x7   :  { %31 = dma.hbm_to_vmem [thread:$0]  %s27_s16, 256, %s29_s18, [#allocation6]  }
   0x8   :  { %143 = dma.done.wait [#allocation3], 256  }
   0x9   :  { %144 = vsyncadd [#allocation3], 4294967040 }
   0xa   :  { %145 = dma.done.wait [#allocation6], 256  }
   0xb   :  { %146 = vsyncadd [#allocation6], 4294967040  ;;  %v40_v0 = vld [vmem:[#allocation2] sm:$0xff]  ;;  %v41_v1 = vld [vmem:[#allocation5] sm:$0xff]  ;;  %s151_s0 = smov [#allocation7]   ;;  %s57_s21 = sshll.u32 %s178_s2, 4  ;;  %s58_s21 = int_to_ptr.hbm [resolvable:$true] %s57_s21 }
   0xc   :  { %v44_v2 = vld [vmem:[#allocation2 + $0x8] sm:$0xff]  ;;  %v42_v3 = vsub.f32 %v40_v0, %v41_v1  ;;  %v45_v4 = vld [vmem:[#allocation5 + $0x8] sm:$0xff]  ;;  %s55_s19 = sshll.u32 %s151_s0, 4  ;;  %s56_s19 = int_to_ptr.vmem [resolvable:$true] %s55_s19 }
   0xd   :  { %v46_v5 = vsub.f32 %v44_v2, %v45_v4 }
   0xe   :  { %v43_v6 = vmul.f32 %v42_v3, %v42_v3 }
   0xf   :  { %v47_v7 = vmul.f32 %v46_v5, %v46_v5 }
  0x11   :  { %v48_v8 = vadd.f32 %v47_v7, %v43_v6 }
  0x13   :  { %49 = vst [vmem:[#allocation7] sm:$0xff] %v48_v8 }
  0x14   :  { %60 = dma.vmem_to_hbm [thread:$0]  %s56_s19, 128, %s58_s21, [#allocation4]  }
  0x15   :  { %147 = dma.done.wait [#allocation4], 128  }
  0x16   :  { %148 = vsyncadd [#allocation4], 4294967168 }
  0x17   :  { %65 = vsyncpa [#allocation3], 1 }
  0x18   :  { %66 = vsyncpa [#allocation6], 1 }
  0x19   :  { %67 = vsyncpa [#allocation4], 1 }

</bundles_post_ra>
